<compile_context>
chip_gen: v6e
topology: v6e:2x2x1
jax: 0.10.0
libtpu: 0.0.40
codegen_flags: <defaults>
</compile_context>

<pallas_src>
import functools
import inspect

import jax
import jax.numpy as jnp
from jax.experimental import pallas as pl
from jax.experimental.pallas import tpu as pltpu

_SUBLANES = 8


def _round_up(n, m):
    return ((n + m - 1) // m) * m


def _pipeline_mode_supported():
    try:
        return (hasattr(pl, "Buffered")
                and "pipeline_mode" in inspect.signature(pl.BlockSpec).parameters)
    except (TypeError, ValueError):
        return False


# Resolved lazily: flips to False (once) if Mosaic rejects Buffered(1).
_SINGLE_BUFFER_OK = [_pipeline_mode_supported()]


def _mlp_kernel(*refs, relu_flags, apply_td):
    """Fused MLP: [Linear (+ReLU)] x L, then optional * total_demands.

    refs = x_ref, (td_ref?), w0, b0, w1, b1, ..., o_ref
    Matmuls run in the operand dtype (f32 or bf16) with f32 accumulation.
    """
    num_layers = len(relu_flags)
    idx = 0
    x_ref = refs[idx]
    idx += 1
    td_ref = None
    if apply_td:
        td_ref = refs[idx]
        idx += 1
    wb_refs = refs[idx:idx + 2 * num_layers]
    o_ref = refs[-1]

    h = x_ref[...]
    for l in range(num_layers):
        w_ref = wb_refs[2 * l]
        b_ref = wb_refs[2 * l + 1]
        # Matched (possibly bf16) MXU operands, f32 accumulation.
        h = jnp.dot(h.astype(w_ref.dtype), w_ref[...],
                    preferred_element_type=jnp.float32) + b_ref[...]
        if relu_flags[l]:
            h = jnp.maximum(h, 0.0)

    if apply_td:
        h = h * td_ref[...].astype(jnp.float32)   # eval-mode per-row scaling
    o_ref[...] = h.astype(o_ref.dtype)


def primal_net_forward(x, params, total_demands=None, *,
                       tile_b=512, compute_dtype=jnp.bfloat16,
                       min_grid_steps=2, single_buffer_params=True):
    """Pallas-backed forward pass of PrimalNet.

    params: flat tuple (w0, b0, w1, b1, ..., wL, bL) with w_i of shape
            (in_features, out_features).
    total_demands: optional (B,), (B,1) or (B, ydim) eval-mode scaling.
    compute_dtype: matmul operand dtype (f32 accumulation is always kept).
            Default bf16 = native MXU rate + half the operand DMA bytes.
            Pass jnp.float32 (or None) for exact-f32 semantics.
    For repeated calls prefer `make_primal_net(params, ...)`, which bakes the
    cast/reshaped parameters in once instead of per call.
    """
    assert x.ndim == 2 and len(params) % 2 == 0 and len(params) > 0
    num_layers = len(params) // 2
    B, xdim = x.shape
    ydim = int(params[-2].shape[1])
    out_dtype = x.dtype

    ws = [params[2 * l] for l in range(num_layers)]
    bs = [params[2 * l + 1] for l in range(num_layers)]

    # PyTorch spec: a ReLU follows every Linear whose out_size != ydim.  This
    # intentionally mirrors the module's construction (including the corner
    # case hidden_size == ydim, which gets no ReLU there either).
    relu_flags = tuple(int(w.shape[1]) != ydim for w in ws)

    if compute_dtype is None:
        compute_dtype = x.dtype
    x = x.astype(compute_dtype)
    ws = [w.astype(compute_dtype) for w in ws]
    bs = [b.reshape(1, -1).astype(jnp.float32) for b in bs]

    # --- batch tiling --------------------------------------------------------
    #  * balanced tiles keep ragged-batch padding below one row-alignment group
    #  * >=2 grid steps (when B allows) so the "parallel" axis shards across
    #    both TensorCores on v7x; costs ~0.35us extra on single-TC chips
    #  * bf16 packs 2 rows/sublane -> align rows to 16 instead of 8
    row_align = (2 * _SUBLANES
                 if jnp.dtype(compute_dtype).itemsize == 2 else _SUBLANES)
    n_steps = pl.cdiv(B, tile_b)
    if B >= min_grid_steps * row_align:
        n_steps = max(n_steps, min_grid_steps)
    tile_b_eff = _round_up(pl.cdiv(B, n_steps), row_align)
    n_steps = pl.cdiv(B, tile_b_eff)
    B_pad = n_steps * tile_b_eff
    if B_pad != B:
        x = jnp.pad(x, ((0, B_pad - B), (0, 0)))

    apply_td = total_demands is not None
    inputs = [x]
    td_w = 0
    if apply_td:
        td = jnp.asarray(total_demands).reshape(B, -1).astype(jnp.float32)
        td_w = td.shape[1]
        if td_w not in (1, ydim):
            raise ValueError("total_demands must broadcast against (B, ydim)")
        if B_pad != B:
            td = jnp.pad(td, ((0, B_pad - B), (0, 0)))
        inputs.append(td)
    for w, b in zip(ws, bs):
        inputs += [w, b]

    grid = (n_steps,)

    # Rough VMEM bound: double-buffered x/td/out tiles + params + f32 acts.
    isz = lambda dt: jnp.dtype(dt).itemsize
    tile_io = tile_b_eff * (xdim * isz(compute_dtype) + td_w * 4
                            + ydim * isz(out_dtype))
    param_bytes = sum(int(w.size) * isz(w.dtype) + int(b.size) * 4
                      for w, b in zip(ws, bs))
    max_width = max([xdim] + [int(w.shape[1]) for w in ws])
    vmem_est = 2 * tile_io + 2 * param_bytes + 4 * tile_b_eff * max_width
    vmem_limit = None
    if vmem_est > (16 << 20):                 # conservative v5e scoped default
        vmem_limit = min(int(1.5 * vmem_est), 96 << 20)

    def _call(single_buffer):
        def rep(shape):
            # Grid-invariant parameter block: constant index_map, so double
            # buffering gives no overlap and only doubles parameter VMEM.
            if single_buffer:
                return pl.BlockSpec(shape, lambda i: (0, 0),
                                    pipeline_mode=pl.Buffered(1))
            return pl.BlockSpec(shape, lambda i: (0, 0))

        in_specs = [pl.BlockSpec((tile_b_eff, xdim), lambda i: (i, 0))]
        if apply_td:
            in_specs.append(pl.BlockSpec((tile_b_eff, td_w),
                                         lambda i: (i, 0)))
        for w, b in zip(ws, bs):
            in_specs += [rep(w.shape), rep(b.shape)]

        return pl.pallas_call(
            functools.partial(_mlp_kernel,
                              relu_flags=relu_flags, apply_td=apply_td),
            # Output last dim == full array dim (legal block): 16x less HBM
            # writeback than padding ydim up to 128 lanes.
            out_shape=jax.ShapeDtypeStruct((B_pad, ydim), out_dtype),
            grid_spec=pltpu.PrefetchScalarGridSpec(
                num_scalar_prefetch=0,
                grid=grid,
                in_specs=in_specs,
                out_specs=pl.BlockSpec((tile_b_eff, ydim), lambda i: (i, 0)),
            ),
            compiler_params=pltpu.CompilerParams(
                dimension_semantics=("parallel",),
                vmem_limit_bytes=vmem_limit),
        )(*inputs)

    use_sb = bool(single_buffer_params) and _SINGLE_BUFFER_OK[0]
    try:
        out = _call(use_sb)
    except Exception:
        if not use_sb:
            raise
        _SINGLE_BUFFER_OK[0] = False          # remember; retry double-buffered
        out = _call(False)

    return out[:B] if B_pad != B else out


def make_primal_net(params, *, tile_b=512, compute_dtype=jnp.bfloat16):
    """Returns a jitted forward fn with the parameters baked in as constants,
    so the weight cast / bias reshape happens once (at trace/compile time)
    rather than on every call."""
    params = tuple(jnp.asarray(p) for p in params)

    @functools.partial(jax.jit, static_argnames=("use_td",))
    def _fwd(x, td, use_td):
        return primal_net_forward(x, params,
                                  total_demands=td if use_td else None,
                                  tile_b=tile_b, compute_dtype=compute_dtype)

    def fwd(x, total_demands=None):
        if total_demands is None:
            dummy = jnp.zeros((x.shape[0], 1), x.dtype)
            return _fwd(x, dummy, use_td=False)
        return _fwd(x, total_demands, use_td=True)

    return fwd


def init_params(key, xdim, hidden, ydim, n_layers=2, dtype=jnp.float32):
    """Mirrors the PyTorch module: kaiming_normal_ weights (std=sqrt(2/fan_in)),
    default nn.Linear uniform(-1/sqrt(fan_in), 1/sqrt(fan_in)) biases."""
    sizes = [xdim] + [hidden] * n_layers + [ydim]
    params = []
    for fan_in, fan_out in zip(sizes[:-1], sizes[1:]):
        key, kw, kb = jax.random.split(key, 3)
        std = (2.0 / fan_in) ** 0.5
        w = (jax.random.normal(kw, (fan_in, fan_out)) * std).astype(dtype)
        bound = 1.0 / (fan_in ** 0.5)
        b = jax.random.uniform(kb, (1, fan_out), minval=-bound,
                               maxval=bound).astype(dtype)
        params += [w, b]
    return tuple(params)


def _reference_forward(x, params, total_demands=None):
    num_layers = len(params) // 2
    ydim = params[-2].shape[1]
    h = x
    for l in range(num_layers):
        w, b = params[2 * l], params[2 * l + 1]
        h = h @ w + b.reshape(1, -1)
        if w.shape[1] != ydim:
            h = jnp.maximum(h, 0.0)
    if total_demands is not None:
        h = h * jnp.asarray(total_demands).reshape(x.shape[0], -1)
    return h


if __name__ == "__main__":
    # Small shapes implied by the module: xdim -> hidden (n_layers=2) -> ydim.
    # B=50 exercises the ragged-batch / balanced-tile / forced-2-step path.
    B, XDIM, HIDDEN, YDIM = 50, 16, 32, 8

    key = jax.random.PRNGKey(0)
    k_params, k_x, k_td = jax.random.split(key, 3)

    params = init_params(k_params, XDIM, HIDDEN, YDIM, n_layers=2)
    x = jax.random.normal(k_x, (B, XDIM), dtype=jnp.float32)
    total_demands = jax.random.uniform(k_td, (B, 1), dtype=jnp.float32) + 0.5

    # f32-operand paths: bitwise-tight vs the reference.
    out_train = primal_net_forward(x, params, None,
                                   compute_dtype=jnp.float32)
    out_eval = primal_net_forward(x, params, total_demands,
                                  compute_dtype=jnp.float32)
    # Small tile -> multi-step "parallel" grid (same math, more steps).
    out_multi = primal_net_forward(x, params, total_demands, tile_b=16,
                                   compute_dtype=jnp.float32)

    # Default perf config: bf16 operands / f32 accumulation, params baked into
    # a jitted forward so casts are not repeated per call.
    net = make_primal_net(params)
    out_bf16_eval = net(x, total_demands)
    out_bf16_train = net(x)

    jax.block_until_ready((out_train, out_eval, out_multi,
                           out_bf16_eval, out_bf16_train))

    ref_train = _reference_forward(x, params, None)
    ref_eval = _reference_forward(x, params, total_demands)

    assert out_train.shape == (B, YDIM) and out_eval.shape == (B, YDIM)
    assert jnp.allclose(out_train, ref_train, atol=1e-5, rtol=1e-5)
    assert jnp.allclose(out_eval, ref_eval, atol=1e-5, rtol=1e-5)
    assert jnp.allclose(out_multi, ref_eval, atol=1e-5, rtol=1e-5)
    assert jnp.allclose(out_bf16_eval, ref_eval, atol=1e-1, rtol=1e-1)
    assert jnp.allclose(out_bf16_train, ref_train, atol=1e-1, rtol=1e-1)

    print("KERNEL_OK")
</pallas_src>

<mosaic_0001>
module attributes {stable_mosaic.version = 11 : i64} {
  func.func @_mlp_kernel(%arg0: i32, %arg1: memref<32x16xf32, #tpu.memory_space<vmem>>, %arg2: memref<16x32xf32, #tpu.memory_space<vmem>>, %arg3: memref<1x32xf32, #tpu.memory_space<vmem>>, %arg4: memref<32x32xf32, #tpu.memory_space<vmem>>, %arg5: memref<1x32xf32, #tpu.memory_space<vmem>>, %arg6: memref<32x8xf32, #tpu.memory_space<vmem>>, %arg7: memref<1x8xf32, #tpu.memory_space<vmem>>, %arg8: memref<32x8xf32, #tpu.memory_space<vmem>>) attributes {dimension_semantics = [#tpu.dimension_semantics<parallel>], iteration_bounds = array<i64: 2>, scalar_prefetch = 0 : i64, scratch_operands = 0 : i64, tpu.core_type = #tpu.core_type<tc>, window_params = [{transform_indices = @transform_0, window_bounds = array<i64: 32, 16>}, {pipeline_mode = #tpu.pipeline_mode<synchronous>, transform_indices = @transform_1, window_bounds = array<i64: 16, 32>}, {pipeline_mode = #tpu.pipeline_mode<synchronous>, transform_indices = @transform_2, window_bounds = array<i64: 1, 32>}, {pipeline_mode = #tpu.pipeline_mode<synchronous>, transform_indices = @transform_3, window_bounds = array<i64: 32, 32>}, {pipeline_mode = #tpu.pipeline_mode<synchronous>, transform_indices = @transform_4, window_bounds = array<i64: 1, 32>}, {pipeline_mode = #tpu.pipeline_mode<synchronous>, transform_indices = @transform_5, window_bounds = array<i64: 32, 8>}, {pipeline_mode = #tpu.pipeline_mode<synchronous>, transform_indices = @transform_6, window_bounds = array<i64: 1, 8>}, {transform_indices = @transform_7, window_bounds = array<i64: 32, 8>}]} {
    %c0 = arith.constant 0 : index
    %c0_0 = arith.constant 0 : index
    %0 = vector.load %arg1[%c0, %c0_0] : memref<32x16xf32, #tpu.memory_space<vmem>>, vector<32x16xf32>
    %c0_1 = arith.constant 0 : index
    %c0_2 = arith.constant 0 : index
    %1 = vector.load %arg2[%c0_1, %c0_2] : memref<16x32xf32, #tpu.memory_space<vmem>>, vector<16x32xf32>
    %cst = arith.constant dense<0.000000e+00> : vector<32x32xf32>
    %2 = tpu.matmul %0, %1, %cst {dimension_numbers = #tpu.dot_dimension_numbers<[1], [0], [0], [1], [0, 0, 1, 1], [], []>} : vector<32x16xf32>, vector<16x32xf32>, vector<32x32xf32> -> vector<32x32xf32>
    %c0_3 = arith.constant 0 : index
    %c0_4 = arith.constant 0 : index
    %3 = vector.load %arg3[%c0_3, %c0_4] : memref<1x32xf32, #tpu.memory_space<vmem>>, vector<1x32xf32>
    %4 = vector.broadcast %3 : vector<1x32xf32> to vector<32x32xf32>
    %5 = arith.addf %2, %4 : vector<32x32xf32>
    %cst_5 = arith.constant 0.000000e+00 : f32
    %6 = vector.broadcast %cst_5 : f32 to vector<32x32xf32>
    %7 = arith.maximumf %5, %6 : vector<32x32xf32>
    %c0_6 = arith.constant 0 : index
    %c0_7 = arith.constant 0 : index
    %8 = vector.load %arg4[%c0_6, %c0_7] : memref<32x32xf32, #tpu.memory_space<vmem>>, vector<32x32xf32>
    %cst_8 = arith.constant dense<0.000000e+00> : vector<32x32xf32>
    %9 = tpu.matmul %7, %8, %cst_8 {dimension_numbers = #tpu.dot_dimension_numbers<[1], [0], [0], [1], [0, 0, 1, 1], [], []>} : vector<32x32xf32>, vector<32x32xf32>, vector<32x32xf32> -> vector<32x32xf32>
    %c0_9 = arith.constant 0 : index
    %c0_10 = arith.constant 0 : index
    %10 = vector.load %arg5[%c0_9, %c0_10] : memref<1x32xf32, #tpu.memory_space<vmem>>, vector<1x32xf32>
    %11 = vector.broadcast %10 : vector<1x32xf32> to vector<32x32xf32>
    %12 = arith.addf %9, %11 : vector<32x32xf32>
    %cst_11 = arith.constant 0.000000e+00 : f32
    %13 = vector.broadcast %cst_11 : f32 to vector<32x32xf32>
    %14 = arith.maximumf %12, %13 : vector<32x32xf32>
    %c0_12 = arith.constant 0 : index
    %c0_13 = arith.constant 0 : index
    %15 = vector.load %arg6[%c0_12, %c0_13] : memref<32x8xf32, #tpu.memory_space<vmem>>, vector<32x8xf32>
    %cst_14 = arith.constant dense<0.000000e+00> : vector<32x8xf32>
    %16 = tpu.matmul %14, %15, %cst_14 {dimension_numbers = #tpu.dot_dimension_numbers<[1], [0], [0], [1], [0, 0, 1, 1], [], []>} : vector<32x32xf32>, vector<32x8xf32>, vector<32x8xf32> -> vector<32x8xf32>
    %c0_15 = arith.constant 0 : index
    %c0_16 = arith.constant 0 : index
    %17 = vector.load %arg7[%c0_15, %c0_16] : memref<1x8xf32, #tpu.memory_space<vmem>>, vector<1x8xf32>
    %18 = vector.broadcast %17 : vector<1x8xf32> to vector<32x8xf32>
    %19 = arith.addf %16, %18 : vector<32x8xf32>
    %c0_17 = arith.constant 0 : index
    %c0_18 = arith.constant 0 : index
    %20 = vector.load %arg8[%c0_17, %c0_18] : memref<32x8xf32, #tpu.memory_space<vmem>>, vector<32x8xf32>
    tpu.vector_store %arg8[%c0_17, %c0_18], %19 {strides = array<i32>} : memref<32x8xf32, #tpu.memory_space<vmem>>, vector<32x8xf32>,
    return
  }
  func.func @transform_0(%arg0: i32) -> (i32, i32) {
    %c0_i32 = arith.constant 0 : i32
    %c0_i32_0 = arith.constant 0 : i32
    return %arg0, %c0_i32 : i32, i32
  }
  func.func @transform_1(%arg0: i32) -> (i32, i32) {
    %c0_i32 = arith.constant 0 : i32
    %c0_i32_0 = arith.constant 0 : i32
    %c0_i32_1 = arith.constant 0 : i32
    return %c0_i32, %c0_i32_0 : i32, i32
  }
  func.func @transform_2(%arg0: i32) -> (i32, i32) {
    %c0_i32 = arith.constant 0 : i32
    %c0_i32_0 = arith.constant 0 : i32
    %c0_i32_1 = arith.constant 0 : i32
    return %c0_i32, %c0_i32_0 : i32, i32
  }
  func.func @transform_3(%arg0: i32) -> (i32, i32) {
    %c0_i32 = arith.constant 0 : i32
    %c0_i32_0 = arith.constant 0 : i32
    %c0_i32_1 = arith.constant 0 : i32
    return %c0_i32, %c0_i32_0 : i32, i32
  }
  func.func @transform_4(%arg0: i32) -> (i32, i32) {
    %c0_i32 = arith.constant 0 : i32
    %c0_i32_0 = arith.constant 0 : i32
    %c0_i32_1 = arith.constant 0 : i32
    return %c0_i32, %c0_i32_0 : i32, i32
  }
  func.func @transform_5(%arg0: i32) -> (i32, i32) {
    %c0_i32 = arith.constant 0 : i32
    %c0_i32_0 = arith.constant 0 : i32
    %c0_i32_1 = arith.constant 0 : i32
    return %c0_i32, %c0_i32_0 : i32, i32
  }
  func.func @transform_6(%arg0: i32) -> (i32, i32) {
    %c0_i32 = arith.constant 0 : i32
    %c0_i32_0 = arith.constant 0 : i32
    %c0_i32_1 = arith.constant 0 : i32
    return %c0_i32, %c0_i32_0 : i32, i32
  }
  func.func @transform_7(%arg0: i32) -> (i32, i32) {
    %c0_i32 = arith.constant 0 : i32
    %c0_i32_0 = arith.constant 0 : i32
    return %arg0, %c0_i32 : i32, i32
  }
}

module attributes {stable_mosaic.version = 11 : i64} {
  func.func @_mlp_kernel(%arg0: i32, %arg1: memref<32x16xf32, #tpu.memory_space<vmem>>, %arg2: memref<16x32xf32, #tpu.memory_space<vmem>>, %arg3: memref<1x32xf32, #tpu.memory_space<vmem>>, %arg4: memref<32x32xf32, #tpu.memory_space<vmem>>, %arg5: memref<1x32xf32, #tpu.memory_space<vmem>>, %arg6: memref<32x8xf32, #tpu.memory_space<vmem>>, %arg7: memref<1x8xf32, #tpu.memory_space<vmem>>, %arg8: memref<32x8xf32, #tpu.memory_space<vmem>>) attributes {dimension_semantics = [#tpu.dimension_semantics<parallel>], iteration_bounds = array<i64: 2>, scalar_prefetch = 0 : i64, scratch_operands = 0 : i64, tpu.core_type = #tpu.core_type<tc>, window_params = [{transform_indices = @transform_0, window_bounds = array<i64: 32, 16>}, {pipeline_mode = #tpu.pipeline_mode<synchronous>, transform_indices = @transform_1, window_bounds = array<i64: 16, 32>}, {pipeline_mode = #tpu.pipeline_mode<synchronous>, transform_indices = @transform_2, window_bounds = array<i64: 1, 32>}, {pipeline_mode = #tpu.pipeline_mode<synchronous>, transform_indices = @transform_3, window_bounds = array<i64: 32, 32>}, {pipeline_mode = #tpu.pipeline_mode<synchronous>, transform_indices = @transform_4, window_bounds = array<i64: 1, 32>}, {pipeline_mode = #tpu.pipeline_mode<synchronous>, transform_indices = @transform_5, window_bounds = array<i64: 32, 8>}, {pipeline_mode = #tpu.pipeline_mode<synchronous>, transform_indices = @transform_6, window_bounds = array<i64: 1, 8>}, {transform_indices = @transform_7, window_bounds = array<i64: 32, 8>}]} {
    %c0 = arith.constant 0 : index
    %c0_0 = arith.constant 0 : index
    %0 = vector.load %arg1[%c0, %c0_0] : memref<32x16xf32, #tpu.memory_space<vmem>>, vector<32x16xf32>
    %c0_1 = arith.constant 0 : index
    %c0_2 = arith.constant 0 : index
    %1 = vector.load %arg2[%c0_1, %c0_2] : memref<16x32xf32, #tpu.memory_space<vmem>>, vector<16x32xf32>
    %cst = arith.constant dense<0.000000e+00> : vector<32x32xf32>
    %2 = tpu.matmul %0, %1, %cst {dimension_numbers = #tpu.dot_dimension_numbers<[1], [0], [0], [1], [0, 0, 1, 1], [], []>} : vector<32x16xf32>, vector<16x32xf32>, vector<32x32xf32> -> vector<32x32xf32>
    %c0_3 = arith.constant 0 : index
    %c0_4 = arith.constant 0 : index
    %3 = vector.load %arg3[%c0_3, %c0_4] : memref<1x32xf32, #tpu.memory_space<vmem>>, vector<1x32xf32>
    %4 = vector.broadcast %3 : vector<1x32xf32> to vector<32x32xf32>
    %5 = arith.addf %2, %4 : vector<32x32xf32>
    %cst_5 = arith.constant 0.000000e+00 : f32
    %6 = vector.broadcast %cst_5 : f32 to vector<32x32xf32>
    %7 = arith.maximumf %5, %6 : vector<32x32xf32>
    %c0_6 = arith.constant 0 : index
    %c0_7 = arith.constant 0 : index
    %8 = vector.load %arg4[%c0_6, %c0_7] : memref<32x32xf32, #tpu.memory_space<vmem>>, vector<32x32xf32>
    %cst_8 = arith.constant dense<0.000000e+00> : vector<32x32xf32>
    %9 = tpu.matmul %7, %8, %cst_8 {dimension_numbers = #tpu.dot_dimension_numbers<[1], [0], [0], [1], [0, 0, 1, 1], [], []>} : vector<32x32xf32>, vector<32x32xf32>, vector<32x32xf32> -> vector<32x32xf32>
    %c0_9 = arith.constant 0 : index
    %c0_10 = arith.constant 0 : index
    %10 = vector.load %arg5[%c0_9, %c0_10] : memref<1x32xf32, #tpu.memory_space<vmem>>, vector<1x32xf32>
    %11 = vector.broadcast %10 : vector<1x32xf32> to vector<32x32xf32>
    %12 = arith.addf %9, %11 : vector<32x32xf32>
    %cst_11 = arith.constant 0.000000e+00 : f32
    %13 = vector.broadcast %cst_11 : f32 to vector<32x32xf32>
    %14 = arith.maximumf %12, %13 : vector<32x32xf32>
    %c0_12 = arith.constant 0 : index
    %c0_13 = arith.constant 0 : index
    %15 = vector.load %arg6[%c0_12, %c0_13] : memref<32x8xf32, #tpu.memory_space<vmem>>, vector<32x8xf32>
    %cst_14 = arith.constant dense<0.000000e+00> : vector<32x8xf32>
    %16 = tpu.matmul %14, %15, %cst_14 {dimension_numbers = #tpu.dot_dimension_numbers<[1], [0], [0], [1], [0, 0, 1, 1], [], []>} : vector<32x32xf32>, vector<32x8xf32>, vector<32x8xf32> -> vector<32x8xf32>
    %c0_15 = arith.constant 0 : index
    %c0_16 = arith.constant 0 : index
    %17 = vector.load %arg7[%c0_15, %c0_16] : memref<1x8xf32, #tpu.memory_space<vmem>>, vector<1x8xf32>
    %18 = vector.broadcast %17 : vector<1x8xf32> to vector<32x8xf32>
    %19 = arith.addf %16, %18 : vector<32x8xf32>
    %c0_17 = arith.constant 0 : index
    %c0_18 = arith.constant 0 : index
    %20 = vector.load %arg8[%c0_17, %c0_18] : memref<32x8xf32, #tpu.memory_space<vmem>>, vector<32x8xf32>
    tpu.vector_store %arg8[%c0_17, %c0_18], %19 {strides = array<i32>} : memref<32x8xf32, #tpu.memory_space<vmem>>, vector<32x8xf32>,
    return
  }
  func.func @transform_0(%arg0: i32) -> (i32, i32) {
    %c0_i32 = arith.constant 0 : i32
    %c0_i32_0 = arith.constant 0 : i32
    return %arg0, %c0_i32 : i32, i32
  }
  func.func @transform_1(%arg0: i32) -> (i32, i32) {
    %c0_i32 = arith.constant 0 : i32
    %c0_i32_0 = arith.constant 0 : i32
    %c0_i32_1 = arith.constant 0 : i32
    return %c0_i32, %c0_i32_0 : i32, i32
  }
  func.func @transform_2(%arg0: i32) -> (i32, i32) {
    %c0_i32 = arith.constant 0 : i32
    %c0_i32_0 = arith.constant 0 : i32
    %c0_i32_1 = arith.constant 0 : i32
    return %c0_i32, %c0_i32_0 : i32, i32
  }
  func.func @transform_3(%arg0: i32) -> (i32, i32) {
    %c0_i32 = arith.constant 0 : i32
    %c0_i32_0 = arith.constant 0 : i32
    %c0_i32_1 = arith.constant 0 : i32
    return %c0_i32, %c0_i32_0 : i32, i32
  }
  func.func @transform_4(%arg0: i32) -> (i32, i32) {
    %c0_i32 = arith.constant 0 : i32
    %c0_i32_0 = arith.constant 0 : i32
    %c0_i32_1 = arith.constant 0 : i32
    return %c0_i32, %c0_i32_0 : i32, i32
  }
  func.func @transform_5(%arg0: i32) -> (i32, i32) {
    %c0_i32 = arith.constant 0 : i32
    %c0_i32_0 = arith.constant 0 : i32
    %c0_i32_1 = arith.constant 0 : i32
    return %c0_i32, %c0_i32_0 : i32, i32
  }
  func.func @transform_6(%arg0: i32) -> (i32, i32) {
    %c0_i32 = arith.constant 0 : i32
    %c0_i32_0 = arith.constant 0 : i32
    %c0_i32_1 = arith.constant 0 : i32
    return %c0_i32, %c0_i32_0 : i32, i32
  }
  func.func @transform_7(%arg0: i32) -> (i32, i32) {
    %c0_i32 = arith.constant 0 : i32
    %c0_i32_0 = arith.constant 0 : i32
    return %arg0, %c0_i32 : i32, i32
  }
}

</mosaic_0001>

<bundles_post_ra>
// kernel: tpu_custom_call.1
= control target key start
LH: loop header
LB: loop body
LE: loop exit
PB: predicated region body
PF: predicated region fallthrough
CT: control target
= control target key end

     0   :  { %s821_s24 = smov 0   ;;  %s892_s0 = inlined_call_operand.vmem [shape: f32[64,16], index: 0, kind: input, shape index: {}]   ;;  %s893_s1 = inlined_call_operand.vmem [shape: f32[16,32], index: 1, kind: input, shape index: {}]   ;;  %s894_s2 = inlined_call_operand.vmem [shape: f32[1,32], index: 2, kind: input, shape index: {}]   ;;  %s895_s3 = inlined_call_operand.vmem [shape: f32[32,32], index: 3, kind: input, shape index: {}]   ;;  %s896_s4 = inlined_call_operand.vmem [shape: f32[1,32], index: 4, kind: input, shape index: {}]   ;;  %s897_s5 = inlined_call_operand.vmem [shape: f32[32,8], index: 5, kind: input, shape index: {}]   ;;  %s898_s6 = inlined_call_operand.vmem [shape: f32[1,8], index: 6, kind: input, shape index: {}]   ;;  %s899_s7 = inlined_call_operand.vmem [shape: f32[64,8], index: 7, kind: output, shape index: {}]  }
   0x1 LB: > { %s679_s25 = sadd.s32 4294967295, %s779_s24   ;;  %p683_p0 = scmp.ge.s32.totalorder %s779_s24, 1  ;;  %s779_s24 = sphi %s821_s24, %s17_s24  }
   0x2   : > { %p238_p1 = scmp.lt.s32.totalorder %s779_s24, 3 }
   0x4   : > { %p239_p2 = pnand %p683_p0, %p238_p1 }
   0x5   : > { %s684_s30 = sshll.u32 (!%p239_p2), %s679_s25, 2 }
   0x6   : > { %242 = sbr.rel (%p239_p2) target bundleno = 618 (0x26a), region = 48  ;;  %p271_p3 = scmp.lt.s32.totalorder (!%p239_p2), %s684_s30, 7 }
   0xb   : > { %v287_v0 = vld [vmem:[%s893_s1 + $0x8] sm:$0xff]  ;;  %v286_v1 = vld [vmem:[%s893_s1] sm:$0xff]  ;;  %s901_s30 = smov (!%p271_p3, %s684_s30), 7  ;;  %vm295_vm0 = vcmask 130048   ;;  %v400_v6 = vld [vmem:[%s895_s3 + $0x18] sm:$0xff]  ;;  %vm408_vm1 = vcmask 261120  }
   0xc   : > { %727 = vmatprep.subr.mxu0 %v287_v0  ;;  %s685_s8 = sshll.u32 %s901_s30, 3  ;;  %737 = vmatprep.subr.mxu1 %v400_v6  ;;  %v399_v7 = vld [vmem:[%s895_s3 + $0x10] sm:$0xff]  ;;  %v398_v8 = vld [vmem:[%s895_s3 + $0x8] sm:$0xff]  ;;  %v397_v9 = vld [vmem:[%s895_s3] sm:$0xff]  ;;  %vm618_vm2 = vcmask 64512  }
   0xd   : > { %728 = vmatpush3.msra.mxu0 %v287_v0  ;;  %s274_s11 = scalar_lea.vmem %s892_s0, %s685_s8  ;;  %738 = vmatpush3.msra.mxu1 %v400_v6  ;;  %v513_v10 = vld [vmem:[%s897_s5 + $0x18] sm:$0xff]  ;;  %v688_v11 = vld [vmem:[%s894_s2] ss:$0 sm:$0xff]  ;;  %v512_v24 = vld [vmem:[%s897_s5 + $0x10] sm:$0xff]  ;;  %s280_s16 = scalar_lea.vmem %s899_s7, %s685_s8 }
   0xe   : > { %729 = vmatprep.subr.mxu0 %v286_v1  ;;  %v282_v2 = vld [vmem:[%s274_s11] sm:$0xff]  ;;  %v283_v3 = vld [vmem:[%s274_s11 + $0x8] sm:$0xff]  ;;  %v284_v4 = vld [vmem:[%s274_s11 + $0x10] sm:$0xff]  ;;  %739 = vmatprep.subr.mxu1 %v399_v7 }
   0xf   : > { %730 = vmatpush3.msra.mxu0 %v286_v1  ;;  %731 = vmatprep.mubr.msk.f32.mxu0 %vm295_vm0, %v282_v2  ;;  %v285_v5 = vld [vmem:[%s274_s11 + $0x18] sm:$0xff]  ;;  %v511_v25 = vld [vmem:[%s897_s5 + $0x8] sm:$0xff]  ;;  %v510_v26 = vld [vmem:[%s897_s5] sm:$0xff] }
  0x10   : > { %732 = vmatmul.mubr.msk.f32.vlgmr.msra.gmra.mxu0 %vm295_vm0, %v283_v3  ;;  %740 = vmatpush3.msra.mxu1 %v399_v7  ;;  %v693_v27 = vld [vmem:[%s896_s4] ss:$0 sm:$0xff] }
  0x11   : > { %734 = vmatprep.mubr.msk.f32.mxu0 %vm295_vm0, %v284_v4  ;;  %741 = vmatprep.subr.mxu1 %v398_v8  ;;  %v698_v41 = vld [vmem:[%s898_s6] ss:$0 sm:$0xff] }
  0x12   : > { %742 = vmatpush3.msra.mxu1 %v398_v8  ;;  %751 = vmatprep.subr.mxu0 %v513_v10 }
  0x13   : > { %743 = vmatprep.subr.mxu1 %v397_v9  ;;  %752 = vmatpush3.msra.mxu0 %v513_v10 }
  0x14   : > { %735 = vmatmul.mubr.msk.f32.gmra.mxu0 %vm295_vm0, %v285_v5  ;;  %744 = vmatpush3.msra.mxu1 %v397_v9 }
  0x15   : > { %753 = vmatprep.subr.mxu0 %v512_v24 }
  0x16   : > { %754 = vmatpush3.msra.mxu0 %v512_v24 }
  0x17   : > { %755 = vmatprep.subr.mxu0 %v511_v25 }
  0x18   : > { %756 = vmatpush3.msra.mxu0 %v511_v25 }
  0x19   : > { %757 = vmatprep.subr.mxu0 %v510_v26 }
  0x1a   : > { %758 = vmatpush3.msra.mxu0 %v510_v26 }
  0xd0   : > { %v733_v12 = vpop.f32.mrf.mxu0 }
  0xd1   : > { %v380_v13 = vadd.f32 %v733_v12, %v688_v11 }
  0xd2   : > { %v374_v14 = vpop.f32.mrf.mxu0 }
  0xd3   : > { %v375_v15 = vadd.f32 %v688_v11, %v374_v14  ;;  %v394_v18 = vmax.f32 %v380_v13, 0.0 }
  0xd4   : > { %v736_v16 = vpop.f32.mrf.mxu0 }
  0xd5   : > { %v393_v17 = vmax.f32 %v375_v15, 0.0  ;;  %v390_v19 = vadd.f32 %v736_v16, %v688_v11 }
  0xd6   : > { %v384_v20 = vpop.f32.mrf.mxu0 }
  0xd7   : > { %v385_v21 = vadd.f32 %v688_v11, %v384_v20  ;;  %745 = vmatprep.mubr.msk.f32.mxu1 %vm408_vm1, %v393_v17  ;;  %v396_v23 = vmax.f32 %v390_v19, 0.0 }
  0xd8   : > { %746 = vmatmul.mubr.msk.f32.vlgmr.msra.gmra.mxu1 %vm408_vm1, %v394_v18 }
  0xd9   : > { %v395_v22 = vmax.f32 %v385_v21, 0.0 }
  0xdb   : > { %748 = vmatprep.mubr.msk.f32.mxu1 %vm408_vm1, %v395_v22 }
  0xdc   : > { %749 = vmatmul.mubr.msk.f32.gmra.mxu1 %vm408_vm1, %v396_v23 }
 0x198   : > { %v747_v28 = vpop.f32.mrf.mxu1 }
 0x199   : > { %v493_v29 = vadd.f32 %v747_v28, %v693_v27 }
 0x19a   : > { %v487_v30 = vpop.f32.mrf.mxu1 }
 0x19b   : > { %v488_v31 = vadd.f32 %v693_v27, %v487_v30  ;;  %v507_v34 = vmax.f32 %v493_v29, 0.0 }
 0x19c   : > { %v750_v32 = vpop.f32.mrf.mxu1 }
 0x19d   : > { %v506_v33 = vmax.f32 %v488_v31, 0.0  ;;  %v503_v35 = vadd.f32 %v750_v32, %v693_v27 }
 0x19e   : > { %v497_v36 = vpop.f32.mrf.mxu1 }
 0x19f   : > { %v498_v37 = vadd.f32 %v693_v27, %v497_v36  ;;  %759 = vmatprep.mubr.msk.f32.mxu0 %vm408_vm1, %v506_v33  ;;  %v509_v39 = vmax.f32 %v503_v35, 0.0 }
 0x1a0   : > { %760 = vmatmul.mubr.msk.f32.vlgmr.msra.gmra.mxu0 %vm408_vm1, %v507_v34 }
 0x1a1   : > { %v508_v38 = vmax.f32 %v498_v37, 0.0 }
 0x1a3   : > { %762 = vmatprep.mubr.msk.f32.mxu0 %vm408_vm1, %v508_v38 }
 0x1a4   : > { %763 = vmatmul.mubr.msk.f32.gmra.mxu0 %vm408_vm1, %v509_v39 }
 0x260   : > { %v761_v40 = vpop.f32.mrf.mxu0 }
 0x261   : > { %v605_v44 = vadd.f32 %v761_v40, %v698_v41 }
 0x262   : > { %v599_v42 = vpop.f32.mrf.mxu0 }
 0x263   : > { %v600_v43 = vadd.f32 %v698_v41, %v599_v42  ;;  %620 = vst.msk [vmem:[%s280_s16 + $0x8] sm:$0xff] %vm618_vm2, %v605_v44 }
 0x264   : > { %v764_v45 = vpop.f32.mrf.mxu0 }
 0x265   : > { %619 = vst.msk [vmem:[%s280_s16] sm:$0xff] %vm618_vm2, %v600_v43  ;;  %v615_v48 = vadd.f32 %v764_v45, %v698_v41 }
 0x266   : > { %v609_v46 = vpop.f32.mrf.mxu0 }
 0x267   : > { %v610_v47 = vadd.f32 %v698_v41, %v609_v46  ;;  %622 = vst.msk [vmem:[%s280_s16 + $0x18] sm:$0xff] %vm618_vm2, %v615_v48 }
 0x269   : > { %621 = vst.msk [vmem:[%s280_s16 + $0x10] sm:$0xff] %vm618_vm2, %v610_v47 }
 0x26a PF: > { %s17_s24 = sadd.s32 1, %s779_s24  }
 0x26b   : > { %p14_p4 = scmp.ge.s32.totalorder %s17_s24, 4  }
 0x26d   :  { %16 = sbr.rel (!%p14_p4) target bundleno = 1 (0x1), region = 78 }

// kernel: tpu_custom_call.1
= control target key start
LH: loop header
LB: loop body
LE: loop exit
PB: predicated region body
PF: predicated region fallthrough
CT: control target
= control target key end

     0   :  { %s821_s24 = smov 0   ;;  %s892_s0 = inlined_call_operand.vmem [shape: f32[64,16], index: 0, kind: input, shape index: {}]   ;;  %s893_s1 = inlined_call_operand.vmem [shape: f32[16,32], index: 1, kind: input, shape index: {}]   ;;  %s894_s2 = inlined_call_operand.vmem [shape: f32[1,32], index: 2, kind: input, shape index: {}]   ;;  %s895_s3 = inlined_call_operand.vmem [shape: f32[32,32], index: 3, kind: input, shape index: {}]   ;;  %s896_s4 = inlined_call_operand.vmem [shape: f32[1,32], index: 4, kind: input, shape index: {}]   ;;  %s897_s5 = inlined_call_operand.vmem [shape: f32[32,8], index: 5, kind: input, shape index: {}]   ;;  %s898_s6 = inlined_call_operand.vmem [shape: f32[1,8], index: 6, kind: input, shape index: {}]   ;;  %s899_s7 = inlined_call_operand.vmem [shape: f32[64,8], index: 7, kind: output, shape index: {}]  }
   0x1 LB: > { %s679_s25 = sadd.s32 4294967295, %s779_s24   ;;  %p683_p0 = scmp.ge.s32.totalorder %s779_s24, 1  ;;  %s779_s24 = sphi %s821_s24, %s17_s24  }
   0x2   : > { %p238_p1 = scmp.lt.s32.totalorder %s779_s24, 3 }
   0x4   : > { %p239_p2 = pnand %p683_p0, %p238_p1 }
   0x5   : > { %s684_s30 = sshll.u32 (!%p239_p2), %s679_s25, 2 }
   0x6   : > { %242 = sbr.rel (%p239_p2) target bundleno = 618 (0x26a), region = 48  ;;  %p271_p3 = scmp.lt.s32.totalorder (!%p239_p2), %s684_s30, 7 }
   0xb   : > { %v287_v0 = vld [vmem:[%s893_s1 + $0x8] sm:$0xff]  ;;  %v286_v1 = vld [vmem:[%s893_s1] sm:$0xff]  ;;  %s901_s30 = smov (!%p271_p3, %s684_s30), 7  ;;  %vm295_vm0 = vcmask 130048   ;;  %v400_v6 = vld [vmem:[%s895_s3 + $0x18] sm:$0xff]  ;;  %vm408_vm1 = vcmask 261120  }
   0xc   : > { %727 = vmatprep.subr.mxu0 %v287_v0  ;;  %s685_s8 = sshll.u32 %s901_s30, 3  ;;  %737 = vmatprep.subr.mxu1 %v400_v6  ;;  %v399_v7 = vld [vmem:[%s895_s3 + $0x10] sm:$0xff]  ;;  %v398_v8 = vld [vmem:[%s895_s3 + $0x8] sm:$0xff]  ;;  %v397_v9 = vld [vmem:[%s895_s3] sm:$0xff]  ;;  %vm618_vm2 = vcmask 64512  }
   0xd   : > { %728 = vmatpush3.msra.mxu0 %v287_v0  ;;  %s274_s11 = scalar_lea.vmem %s892_s0, %s685_s8  ;;  %738 = vmatpush3.msra.mxu1 %v400_v6  ;;  %v513_v10 = vld [vmem:[%s897_s5 + $0x18] sm:$0xff]  ;;  %v688_v11 = vld [vmem:[%s894_s2] ss:$0 sm:$0xff]  ;;  %v512_v24 = vld [vmem:[%s897_s5 + $0x10] sm:$0xff]  ;;  %s280_s16 = scalar_lea.vmem %s899_s7, %s685_s8 }
   0xe   : > { %729 = vmatprep.subr.mxu0 %v286_v1  ;;  %v282_v2 = vld [vmem:[%s274_s11] sm:$0xff]  ;;  %v283_v3 = vld [vmem:[%s274_s11 + $0x8] sm:$0xff]  ;;  %v284_v4 = vld [vmem:[%s274_s11 + $0x10] sm:$0xff]  ;;  %739 = vmatprep.subr.mxu1 %v399_v7 }
   0xf   : > { %730 = vmatpush3.msra.mxu0 %v286_v1  ;;  %731 = vmatprep.mubr.msk.f32.mxu0 %vm295_vm0, %v282_v2  ;;  %v285_v5 = vld [vmem:[%s274_s11 + $0x18] sm:$0xff]  ;;  %v511_v25 = vld [vmem:[%s897_s5 + $0x8] sm:$0xff]  ;;  %v510_v26 = vld [vmem:[%s897_s5] sm:$0xff] }
  0x10   : > { %732 = vmatmul.mubr.msk.f32.vlgmr.msra.gmra.mxu0 %vm295_vm0, %v283_v3  ;;  %740 = vmatpush3.msra.mxu1 %v399_v7  ;;  %v693_v27 = vld [vmem:[%s896_s4] ss:$0 sm:$0xff] }
  0x11   : > { %734 = vmatprep.mubr.msk.f32.mxu0 %vm295_vm0, %v284_v4  ;;  %741 = vmatprep.subr.mxu1 %v398_v8  ;;  %v698_v41 = vld [vmem:[%s898_s6] ss:$0 sm:$0xff] }
  0x12   : > { %742 = vmatpush3.msra.mxu1 %v398_v8  ;;  %751 = vmatprep.subr.mxu0 %v513_v10 }
  0x13   : > { %743 = vmatprep.subr.mxu1 %v397_v9  ;;  %752 = vmatpush3.msra.mxu0 %v513_v10 }
  0x14   : > { %735 = vmatmul.mubr.msk.f32.gmra.mxu0 %vm295_vm0, %v285_v5  ;;  %744 = vmatpush3.msra.mxu1 %v397_v9 }
  0x15   : > { %753 = vmatprep.subr.mxu0 %v512_v24 }
  0x16   : > { %754 = vmatpush3.msra.mxu0 %v512_v24 }
  0x17   : > { %755 = vmatprep.subr.mxu0 %v511_v25 }
  0x18   : > { %756 = vmatpush3.msra.mxu0 %v511_v25 }
  0x19   : > { %757 = vmatprep.subr.mxu0 %v510_v26 }
  0x1a   : > { %758 = vmatpush3.msra.mxu0 %v510_v26 }
  0xd0   : > { %v733_v12 = vpop.f32.mrf.mxu0 }
  0xd1   : > { %v380_v13 = vadd.f32 %v733_v12, %v688_v11 }
  0xd2   : > { %v374_v14 = vpop.f32.mrf.mxu0 }
  0xd3   : > { %v375_v15 = vadd.f32 %v688_v11, %v374_v14  ;;  %v394_v18 = vmax.f32 %v380_v13, 0.0 }
  0xd4   : > { %v736_v16 = vpop.f32.mrf.mxu0 }
  0xd5   : > { %v393_v17 = vmax.f32 %v375_v15, 0.0  ;;  %v390_v19 = vadd.f32 %v736_v16, %v688_v11 }
  0xd6   : > { %v384_v20 = vpop.f32.mrf.mxu0 }
  0xd7   : > { %v385_v21 = vadd.f32 %v688_v11, %v384_v20  ;;  %745 = vmatprep.mubr.msk.f32.mxu1 %vm408_vm1, %v393_v17  ;;  %v396_v23 = vmax.f32 %v390_v19, 0.0 }
  0xd8   : > { %746 = vmatmul.mubr.msk.f32.vlgmr.msra.gmra.mxu1 %vm408_vm1, %v394_v18 }
  0xd9   : > { %v395_v22 = vmax.f32 %v385_v21, 0.0 }
  0xdb   : > { %748 = vmatprep.mubr.msk.f32.mxu1 %vm408_vm1, %v395_v22 }
  0xdc   : > { %749 = vmatmul.mubr.msk.f32.gmra.mxu1 %vm408_vm1, %v396_v23 }
 0x198   : > { %v747_v28 = vpop.f32.mrf.mxu1 }
 0x199   : > { %v493_v29 = vadd.f32 %v747_v28, %v693_v27 }
 0x19a   : > { %v487_v30 = vpop.f32.mrf.mxu1 }
 0x19b   : > { %v488_v31 = vadd.f32 %v693_v27, %v487_v30  ;;  %v507_v34 = vmax.f32 %v493_v29, 0.0 }
 0x19c   : > { %v750_v32 = vpop.f32.mrf.mxu1 }
 0x19d   : > { %v506_v33 = vmax.f32 %v488_v31, 0.0  ;;  %v503_v35 = vadd.f32 %v750_v32, %v693_v27 }
 0x19e   : > { %v497_v36 = vpop.f32.mrf.mxu1 }
 0x19f   : > { %v498_v37 = vadd.f32 %v693_v27, %v497_v36  ;;  %759 = vmatprep.mubr.msk.f32.mxu0 %vm408_vm1, %v506_v33  ;;  %v509_v39 = vmax.f32 %v503_v35, 0.0 }
 0x1a0   : > { %760 = vmatmul.mubr.msk.f32.vlgmr.msra.gmra.mxu0 %vm408_vm1, %v507_v34 }
 0x1a1   : > { %v508_v38 = vmax.f32 %v498_v37, 0.0 }
 0x1a3   : > { %762 = vmatprep.mubr.msk.f32.mxu0 %vm408_vm1, %v508_v38 }
 0x1a4   : > { %763 = vmatmul.mubr.msk.f32.gmra.mxu0 %vm408_vm1, %v509_v39 }
 0x260   : > { %v761_v40 = vpop.f32.mrf.mxu0 }
 0x261   : > { %v605_v44 = vadd.f32 %v761_v40, %v698_v41 }
 0x262   : > { %v599_v42 = vpop.f32.mrf.mxu0 }
 0x263   : > { %v600_v43 = vadd.f32 %v698_v41, %v599_v42  ;;  %620 = vst.msk [vmem:[%s280_s16 + $0x8] sm:$0xff] %vm618_vm2, %v605_v44 }
 0x264   : > { %v764_v45 = vpop.f32.mrf.mxu0 }
 0x265   : > { %619 = vst.msk [vmem:[%s280_s16] sm:$0xff] %vm618_vm2, %v600_v43  ;;  %v615_v48 = vadd.f32 %v764_v45, %v698_v41 }
 0x266   : > { %v609_v46 = vpop.f32.mrf.mxu0 }
 0x267   : > { %v610_v47 = vadd.f32 %v698_v41, %v609_v46  ;;  %622 = vst.msk [vmem:[%s280_s16 + $0x18] sm:$0xff] %vm618_vm2, %v615_v48 }
 0x269   : > { %621 = vst.msk [vmem:[%s280_s16 + $0x10] sm:$0xff] %vm618_vm2, %v610_v47 }
 0x26a PF: > { %s17_s24 = sadd.s32 1, %s779_s24  }
 0x26b   : > { %p14_p4 = scmp.ge.s32.totalorder %s17_s24, 4  }
 0x26d   :  { %16 = sbr.rel (!%p14_p4) target bundleno = 1 (0x1), region = 78 }

</bundles_post_ra>
